<compile_context>
chip_gen: v6e
topology: v6e:2x2x1
jax: 0.10.0
libtpu: 0.0.40
codegen_flags: <defaults>
</compile_context>

<pallas_src>
import jax
import jax.numpy as jnp
from jax import lax
from jax.experimental import pallas as pl
from jax.experimental.pallas import tpu as pltpu


# ----------------------------------------------------------------------------- kernel

def _double_q_kernel(obs_ref, act_ref,
                     w1o_ref, w1a_ref, b1_ref,
                     w2_ref, b2_ref,
                     w3t_ref, b3_ref,
                     out_ref):
    """Fused forward for both Q heads on one batch tile.

    Weights are VMEM-resident (constant index_map).  bf16 MXU operands with f32
    accumulation; bias add / ReLU in f32.  Output is the lane-dense (2, tm) slab
    (row 0 = q1, row 1 = q2).
    NOTE: edge tiles may carry garbage rows (reads past B); all ops here are
    row-independent and OOB output lanes are masked on writeback, so do not add
    any batch-dimension reduction inside this kernel.
    """
    obs = obs_ref[...].astype(jnp.bfloat16)
    act = act_ref[...].astype(jnp.bfloat16)

    # Layer 1 (both heads): x @ [W1_q1 | W1_q2] == obs @ W1_obs + act @ W1_act
    h = (jnp.dot(obs, w1o_ref[...], preferred_element_type=jnp.float32)
         + jnp.dot(act, w1a_ref[...], preferred_element_type=jnp.float32)
         + b1_ref[...])
    h = jnp.maximum(h, 0.0)

    # Layer 2 (both heads): block-diagonal (2H, 2H)
    h = jnp.dot(h.astype(jnp.bfloat16), w2_ref[...],
                preferred_element_type=jnp.float32) + b2_ref[...]
    h = jnp.maximum(h, 0.0)

    # Layer 3 (both heads), lane-dense: W3^T (2, 2H) contracted with h (tm, 2H)
    # on the 2H axis -> (2, tm).  Same MXU pattern as q @ k^T; no transpose.
    out = lax.dot_general(w3t_ref[...], h.astype(jnp.bfloat16),
                          dimension_numbers=(((1,), (1,)), ((), ())),
                          preferred_element_type=jnp.float32)
    out_ref[...] = out + b3_ref[...]


# ----------------------------------------------------------------------------- packed JAX path

def _forward_packed_jax(obs, action, packed):
    """Same packed/bf16-operand math as the kernel, in plain JAX.

    Used both as a numerical reference and as the tiny-batch fast path (where a
    Pallas custom call would be pure launch + fixed DMA overhead)."""
    o = obs.astype(jnp.bfloat16)
    a = action.astype(jnp.bfloat16)
    h = (jnp.dot(o, packed["w1_obs"], preferred_element_type=jnp.float32)
         + jnp.dot(a, packed["w1_act"], preferred_element_type=jnp.float32)
         + packed["b1"])
    h = jnp.maximum(h, 0.0)
    h = jnp.dot(h.astype(jnp.bfloat16), packed["w2"],
                preferred_element_type=jnp.float32) + packed["b2"]
    h = jnp.maximum(h, 0.0)
    out = jnp.dot(h.astype(jnp.bfloat16), packed["w3_t"].T,
                  preferred_element_type=jnp.float32) + packed["b3"].T
    return out[:, 0:1], out[:, 1:2]


# ----------------------------------------------------------------------------- wrapper

_PALLAS_MIN_BATCH = 128


def _pick_tile(batch):
    """Batch tile size.

    - B <= 512: a single full-extent tile (one grid step).
    - Larger B: a multiple of 128 (dense unmasked stores for the (2, tm) output block),
      sized for >= 2 tiles so v7x's two TensorCores both get work, capped at 2048 rows
      so lane-padded double/triple-buffered inputs + f32 activations stay far below the
      16 MiB (v5e) / 32 MiB (v6e, v7x) default scoped-VMEM limits.
    """
    if batch <= 512:
        return batch
    half = -(-batch // 2)                       # cdiv(B, 2): aim for >= 2 tiles
    return min(2048, ((half + 127) // 128) * 128)


def double_q_critic_forward(obs, action, packed, *, force_pallas=False):
    """Returns (q1, q2), each (B, 1) float32, matching the torch module's forward."""
    assert obs.shape[0] == action.shape[0]
    B, obs_dim = obs.shape
    act_dim = action.shape[1]
    H2 = packed["w2"].shape[0]                  # 2 * hidden_dim

    if B < _PALLAS_MIN_BATCH and not force_pallas:
        # Tiny batches: skip the custom call entirely.
        return _forward_packed_jax(obs, action, packed)

    tm = _pick_tile(B)
    num_tiles = pl.cdiv(B, tm)

    def row_spec(cols):
        # Deeper pipelining on the two activation streams for many-step grids
        # (compute per step is tiny; a third buffer hides one more DMA in flight).
        if num_tiles >= 3 and hasattr(pl, "Buffered"):
            try:
                return pl.BlockSpec((tm, cols), lambda i: (i, 0),
                                    pipeline_mode=pl.Buffered(3))
            except TypeError:
                pass
        return pl.BlockSpec((tm, cols), lambda i: (i, 0))

    def const_spec(shape):
        return pl.BlockSpec(shape, lambda i: (0, 0))   # weights: DMA once, stay resident

    rows = num_tiles * tm
    flops = int(2 * rows * (obs_dim * H2 + act_dim * H2 + H2 * H2 + H2 * 2))
    bytes_accessed = int(
        B * obs_dim * obs.dtype.itemsize + B * act_dim * action.dtype.itemsize
        + 2 * B * 4                                                    # (2, B) f32 out
        + (packed["w1_obs"].size + packed["w1_act"].size
           + packed["w2"].size + packed["w3_t"].size) * 2              # bf16 weights
        + (packed["b1"].size + packed["b2"].size + packed["b3"].size) * 4)

    out = pl.pallas_call(
        _double_q_kernel,
        out_shape=jax.ShapeDtypeStruct((2, B), jnp.float32),
        grid=(num_tiles,),
        in_specs=[
            row_spec(obs_dim),
            row_spec(act_dim),
            const_spec((obs_dim, H2)),
            const_spec((act_dim, H2)),
            const_spec((1, H2)),
            const_spec((H2, H2)),
            const_spec((1, H2)),
            const_spec((2, H2)),
            const_spec((2, 1)),
        ],
        out_specs=pl.BlockSpec((2, tm), lambda i: (0, i)),
        compiler_params=pltpu.CompilerParams(dimension_semantics=("parallel",)),
        cost_estimate=pl.CostEstimate(flops=flops, transcendentals=0,
                                      bytes_accessed=bytes_accessed),
    )(obs, action,
      packed["w1_obs"], packed["w1_act"], packed["b1"],
      packed["w2"], packed["b2"],
      packed["w3_t"], packed["b3"])

    # Row 0 = q1, row 1 = q2; reshape (free) back to the torch (B, 1) convention.
    return out[0][:, None], out[1][:, None]


# ----------------------------------------------------------------------------- params

def init_params(key, obs_dim, action_dim, hidden_dim):
    """Per-head params in (in, out) layout, deterministic synthetic init."""
    D = obs_dim + action_dim
    H = hidden_dim
    ks = jax.random.split(key, 6)

    def lin(k, n_in, n_out):
        w = jax.random.normal(k, (n_in, n_out), jnp.float32) / jnp.sqrt(n_in)
        b = jnp.zeros((1, n_out), jnp.float32)
        return w, b

    def head(k3):
        w1, b1 = lin(k3[0], D, H)
        w2, b2 = lin(k3[1], H, H)
        w3, b3 = lin(k3[2], H, 1)
        return dict(w1=w1, b1=b1, w2=w2, b2=b2, w3=w3, b3=b3)

    return head(ks[0:3]), head(ks[3:6])


def _block_diag(a, b):
    m, n = a.shape
    p, q = b.shape
    out = jnp.zeros((m + p, n + q), a.dtype)
    out = out.at[:m, :n].set(a)
    out = out.at[m:, n:].set(b)
    return out


def pack_params(q1p, q2p, obs_dim):
    """One-time host-side packing of both heads into fused bf16 weights (+ f32 biases).

    Natural (unpadded) sizes are kept on purpose: with K, N <= 64 every dot is a single
    MXU pass anyway, and the kernel is memory/overhead-bound.
    """
    W1 = jnp.concatenate([q1p["w1"], q2p["w1"]], axis=1)   # (D, 2H)
    B1 = jnp.concatenate([q1p["b1"], q2p["b1"]], axis=1)   # (1, 2H)
    W2 = _block_diag(q1p["w2"], q2p["w2"])                 # (2H, 2H)
    B2 = jnp.concatenate([q1p["b2"], q2p["b2"]], axis=1)   # (1, 2H)
    W3 = _block_diag(q1p["w3"], q2p["w3"])                 # (2H, 2)
    B3 = jnp.concatenate([q1p["b3"], q2p["b3"]], axis=1)   # (1, 2)
    return dict(
        w1_obs=W1[:obs_dim].astype(jnp.bfloat16),
        w1_act=W1[obs_dim:].astype(jnp.bfloat16),
        b1=B1.astype(jnp.float32),
        w2=W2.astype(jnp.bfloat16), b2=B2.astype(jnp.float32),
        w3_t=W3.T.astype(jnp.bfloat16),                    # (2, 2H), pre-transposed
        b3=B3.T.astype(jnp.float32),                       # (2, 1)
    )


# ----------------------------------------------------------------------------- references

def _reference_forward_f32(obs, action, q1p, q2p):
    """Original (unfused, f32) module math."""
    x = jnp.concatenate([obs, action], axis=-1)

    def mlp(p):
        h = jnp.maximum(x @ p["w1"] + p["b1"], 0.0)
        h = jnp.maximum(h @ p["w2"] + p["b2"], 0.0)
        return h @ p["w3"] + p["b3"]

    return mlp(q1p), mlp(q2p)


# ----------------------------------------------------------------------------- main

if __name__ == "__main__":
    # TODO(synk): the torch module's `self.outputs` logging dict is stateful bookkeeping
    # only; the returned (q1, q2) fully cover the forward semantics.
    batch, obs_dim, action_dim, hidden_dim = 8, 11, 5, 32

    key = jax.random.PRNGKey(0)
    k_obs, k_act, k_param, k_obs2, k_act2 = jax.random.split(key, 5)
    obs = jax.random.normal(k_obs, (batch, obs_dim), jnp.float32)
    action = jax.random.normal(k_act, (batch, action_dim), jnp.float32)

    q1_params, q2_params = init_params(k_param, obs_dim, action_dim, hidden_dim)
    packed = pack_params(q1_params, q2_params, obs_dim)

    # Small batch: run the Pallas kernel explicitly (single full-extent tile).
    q1, q2 = double_q_critic_forward(obs, action, packed, force_pallas=True)
    jax.block_until_ready((q1, q2))
    assert q1.shape == (batch, 1) and q2.shape == (batch, 1)

    # Check against the same packed/bf16 math in plain JAX.
    p1, p2 = _forward_packed_jax(obs, action, packed)
    assert jnp.allclose(q1, p1, atol=2e-3, rtol=2e-3)
    assert jnp.allclose(q2, p2, atol=2e-3, rtol=2e-3)

    # Loose check against the original unfused f32 module math (bf16 operand tolerance).
    r1, r2 = _reference_forward_f32(obs, action, q1_params, q2_params)
    assert jnp.allclose(q1, r1, atol=5e-2, rtol=5e-2)
    assert jnp.allclose(q2, r2, atol=5e-2, rtol=5e-2)

    # Auto-dispatch for tiny batches bypasses Pallas and must agree.
    a1, a2 = double_q_critic_forward(obs, action, packed)
    assert jnp.allclose(q1, a1, atol=2e-3, rtol=2e-3)
    assert jnp.allclose(q2, a2, atol=2e-3, rtol=2e-3)

    # Large ragged batch in bf16: multi-tile "parallel" grid, no host-side padding,
    # Pallas handles the edge block; bf16 inputs end-to-end (halved input DMA traffic).
    big_b = 1029
    obs_b = jax.random.normal(k_obs2, (big_b, obs_dim), jnp.float32).astype(jnp.bfloat16)
    act_b = jax.random.normal(k_act2, (big_b, action_dim), jnp.float32).astype(jnp.bfloat16)
    q1b, q2b = double_q_critic_forward(obs_b, act_b, packed)
    jax.block_until_ready((q1b, q2b))
    p1b, p2b = _forward_packed_jax(obs_b, act_b, packed)
    assert q1b.shape == (big_b, 1) and q2b.shape == (big_b, 1)
    assert jnp.allclose(q1b, p1b, atol=2e-3, rtol=2e-3)
    assert jnp.allclose(q2b, p2b, atol=2e-3, rtol=2e-3)

    print("KERNEL_OK")
</pallas_src>

<mosaic_0001>
module attributes {stable_mosaic.version = 11 : i64} {
  func.func @_double_q_kernel(%arg0: i32, %arg1: memref<8x11xf32, #tpu.memory_space<vmem>>, %arg2: memref<8x5xf32, #tpu.memory_space<vmem>>, %arg3: memref<11x64xbf16, #tpu.memory_space<vmem>>, %arg4: memref<5x64xbf16, #tpu.memory_space<vmem>>, %arg5: memref<1x64xf32, #tpu.memory_space<vmem>>, %arg6: memref<64x64xbf16, #tpu.memory_space<vmem>>, %arg7: memref<1x64xf32, #tpu.memory_space<vmem>>, %arg8: memref<2x64xbf16, #tpu.memory_space<vmem>>, %arg9: memref<2x1xf32, #tpu.memory_space<vmem>>, %arg10: memref<2x8xf32, #tpu.memory_space<vmem>>) attributes {dimension_semantics = [#tpu.dimension_semantics<parallel>], iteration_bounds = array<i64: 1>, scalar_prefetch = 0 : i64, scratch_operands = 0 : i64, tpu.core_type = #tpu.core_type<tc>, window_params = [{transform_indices = @transform_0, window_bounds = array<i64: 8, 11>}, {transform_indices = @transform_1, window_bounds = array<i64: 8, 5>}, {pipeline_mode = #tpu.pipeline_mode<synchronous>, transform_indices = @transform_2, window_bounds = array<i64: 11, 64>}, {pipeline_mode = #tpu.pipeline_mode<synchronous>, transform_indices = @transform_3, window_bounds = array<i64: 5, 64>}, {pipeline_mode = #tpu.pipeline_mode<synchronous>, transform_indices = @transform_4, window_bounds = array<i64: 1, 64>}, {pipeline_mode = #tpu.pipeline_mode<synchronous>, transform_indices = @transform_5, window_bounds = array<i64: 64, 64>}, {pipeline_mode = #tpu.pipeline_mode<synchronous>, transform_indices = @transform_6, window_bounds = array<i64: 1, 64>}, {pipeline_mode = #tpu.pipeline_mode<synchronous>, transform_indices = @transform_7, window_bounds = array<i64: 2, 64>}, {pipeline_mode = #tpu.pipeline_mode<synchronous>, transform_indices = @transform_8, window_bounds = array<i64: 2, 1>}, {transform_indices = @transform_9, window_bounds = array<i64: 2, 8>}]} {
    %c0 = arith.constant 0 : index
    %c0_0 = arith.constant 0 : index
    %0 = vector.load %arg1[%c0, %c0_0] : memref<8x11xf32, #tpu.memory_space<vmem>>, vector<8x11xf32>
    %1 = arith.truncf %0 : vector<8x11xf32> to vector<8x11xbf16>
    %c0_1 = arith.constant 0 : index
    %c0_2 = arith.constant 0 : index
    %2 = vector.load %arg2[%c0_1, %c0_2] : memref<8x5xf32, #tpu.memory_space<vmem>>, vector<8x5xf32>
    %3 = arith.truncf %2 : vector<8x5xf32> to vector<8x5xbf16>
    %c0_3 = arith.constant 0 : index
    %c0_4 = arith.constant 0 : index
    %4 = vector.load %arg3[%c0_3, %c0_4] : memref<11x64xbf16, #tpu.memory_space<vmem>>, vector<11x64xbf16>
    %cst = arith.constant dense<0.000000e+00> : vector<8x64xf32>
    %5 = tpu.matmul %1, %4, %cst {dimension_numbers = #tpu.dot_dimension_numbers<[1], [0], [0], [1], [0, 0, 1, 1], [], []>} : vector<8x11xbf16>, vector<11x64xbf16>, vector<8x64xf32> -> vector<8x64xf32>
    %c0_5 = arith.constant 0 : index
    %c0_6 = arith.constant 0 : index
    %6 = vector.load %arg4[%c0_5, %c0_6] : memref<5x64xbf16, #tpu.memory_space<vmem>>, vector<5x64xbf16>
    %cst_7 = arith.constant dense<0.000000e+00> : vector<8x64xf32>
    %7 = tpu.matmul %3, %6, %cst_7 {dimension_numbers = #tpu.dot_dimension_numbers<[1], [0], [0], [1], [0, 0, 1, 1], [], []>} : vector<8x5xbf16>, vector<5x64xbf16>, vector<8x64xf32> -> vector<8x64xf32>
    %8 = arith.addf %5, %7 : vector<8x64xf32>
    %c0_8 = arith.constant 0 : index
    %c0_9 = arith.constant 0 : index
    %9 = vector.load %arg5[%c0_8, %c0_9] : memref<1x64xf32, #tpu.memory_space<vmem>>, vector<1x64xf32>
    %10 = vector.broadcast %9 : vector<1x64xf32> to vector<8x64xf32>
    %11 = arith.addf %8, %10 : vector<8x64xf32>
    %cst_10 = arith.constant 0.000000e+00 : f32
    %12 = vector.broadcast %cst_10 : f32 to vector<8x64xf32>
    %13 = arith.maximumf %11, %12 : vector<8x64xf32>
    %14 = arith.truncf %13 : vector<8x64xf32> to vector<8x64xbf16>
    %c0_11 = arith.constant 0 : index
    %c0_12 = arith.constant 0 : index
    %15 = vector.load %arg6[%c0_11, %c0_12] : memref<64x64xbf16, #tpu.memory_space<vmem>>, vector<64x64xbf16>
    %cst_13 = arith.constant dense<0.000000e+00> : vector<8x64xf32>
    %16 = tpu.matmul %14, %15, %cst_13 {dimension_numbers = #tpu.dot_dimension_numbers<[1], [0], [0], [1], [0, 0, 1, 1], [], []>} : vector<8x64xbf16>, vector<64x64xbf16>, vector<8x64xf32> -> vector<8x64xf32>
    %c0_14 = arith.constant 0 : index
    %c0_15 = arith.constant 0 : index
    %17 = vector.load %arg7[%c0_14, %c0_15] : memref<1x64xf32, #tpu.memory_space<vmem>>, vector<1x64xf32>
    %18 = vector.broadcast %17 : vector<1x64xf32> to vector<8x64xf32>
    %19 = arith.addf %16, %18 : vector<8x64xf32>
    %cst_16 = arith.constant 0.000000e+00 : f32
    %20 = vector.broadcast %cst_16 : f32 to vector<8x64xf32>
    %21 = arith.maximumf %19, %20 : vector<8x64xf32>
    %c0_17 = arith.constant 0 : index
    %c0_18 = arith.constant 0 : index
    %22 = vector.load %arg8[%c0_17, %c0_18] : memref<2x64xbf16, #tpu.memory_space<vmem>>, vector<2x64xbf16>
    %23 = arith.truncf %21 : vector<8x64xf32> to vector<8x64xbf16>
    %cst_19 = arith.constant dense<0.000000e+00> : vector<2x8xf32>
    %24 = tpu.matmul %22, %23, %cst_19 {dimension_numbers = #tpu.dot_dimension_numbers<[1], [1], [0], [0], [0, 0, 1, 0], [], []>} : vector<2x64xbf16>, vector<8x64xbf16>, vector<2x8xf32> -> vector<2x8xf32>
    %c0_20 = arith.constant 0 : index
    %c0_21 = arith.constant 0 : index
    %25 = vector.load %arg9[%c0_20, %c0_21] : memref<2x1xf32, #tpu.memory_space<vmem>>, vector<2x1xf32>
    %26 = vector.broadcast %25 : vector<2x1xf32> to vector<2x8xf32>
    %27 = arith.addf %24, %26 : vector<2x8xf32>
    %c0_22 = arith.constant 0 : index
    %c0_23 = arith.constant 0 : index
    %28 = vector.load %arg10[%c0_22, %c0_23] : memref<2x8xf32, #tpu.memory_space<vmem>>, vector<2x8xf32>
    tpu.vector_store %arg10[%c0_22, %c0_23], %27 {strides = array<i32>} : memref<2x8xf32, #tpu.memory_space<vmem>>, vector<2x8xf32>,
    return
  }
  func.func @transform_0(%arg0: i32) -> (i32, i32) {
    %c0_i32 = arith.constant 0 : i32
    %c0_i32_0 = arith.constant 0 : i32
    return %arg0, %c0_i32 : i32, i32
  }
  func.func @transform_1(%arg0: i32) -> (i32, i32) {
    %c0_i32 = arith.constant 0 : i32
    %c0_i32_0 = arith.constant 0 : i32
    return %arg0, %c0_i32 : i32, i32
  }
  func.func @transform_2(%arg0: i32) -> (i32, i32) {
    %c0_i32 = arith.constant 0 : i32
    %c0_i32_0 = arith.constant 0 : i32
    %c0_i32_1 = arith.constant 0 : i32
    return %c0_i32, %c0_i32_0 : i32, i32
  }
  func.func @transform_3(%arg0: i32) -> (i32, i32) {
    %c0_i32 = arith.constant 0 : i32
    %c0_i32_0 = arith.constant 0 : i32
    %c0_i32_1 = arith.constant 0 : i32
    return %c0_i32, %c0_i32_0 : i32, i32
  }
  func.func @transform_4(%arg0: i32) -> (i32, i32) {
    %c0_i32 = arith.constant 0 : i32
    %c0_i32_0 = arith.constant 0 : i32
    %c0_i32_1 = arith.constant 0 : i32
    return %c0_i32, %c0_i32_0 : i32, i32
  }
  func.func @transform_5(%arg0: i32) -> (i32, i32) {
    %c0_i32 = arith.constant 0 : i32
    %c0_i32_0 = arith.constant 0 : i32
    %c0_i32_1 = arith.constant 0 : i32
    return %c0_i32, %c0_i32_0 : i32, i32
  }
  func.func @transform_6(%arg0: i32) -> (i32, i32) {
    %c0_i32 = arith.constant 0 : i32
    %c0_i32_0 = arith.constant 0 : i32
    %c0_i32_1 = arith.constant 0 : i32
    return %c0_i32, %c0_i32_0 : i32, i32
  }
  func.func @transform_7(%arg0: i32) -> (i32, i32) {
    %c0_i32 = arith.constant 0 : i32
    %c0_i32_0 = arith.constant 0 : i32
    %c0_i32_1 = arith.constant 0 : i32
    return %c0_i32, %c0_i32_0 : i32, i32
  }
  func.func @transform_8(%arg0: i32) -> (i32, i32) {
    %c0_i32 = arith.constant 0 : i32
    %c0_i32_0 = arith.constant 0 : i32
    %c0_i32_1 = arith.constant 0 : i32
    return %c0_i32, %c0_i32_0 : i32, i32
  }
  func.func @transform_9(%arg0: i32) -> (i32, i32) {
    %c0_i32 = arith.constant 0 : i32
    %c0_i32_0 = arith.constant 0 : i32
    return %c0_i32, %arg0 : i32, i32
  }
}

</mosaic_0001>

<bundles_post_ra>
// kernel: tpu_custom_call.1
= control target key start
LH: loop header
LB: loop body
LE: loop exit
PB: predicated region body
PF: predicated region fallthrough
CT: control target
= control target key end

     0   :  { %14 = vsyncpa [#allocation3], 0  ;;  %s641_s0 = inlined_call_operand.hbm [shape: f32[8,11], index: 0, kind: input, shape index: {}]   ;;  %s642_s1 = inlined_call_operand.hbm [shape: f32[8,5], index: 1, kind: input, shape index: {}]   ;;  %s643_s2 = inlined_call_operand.hbm [shape: bf16[11,64], index: 2, kind: input, shape index: {}]   ;;  %s644_s3 = inlined_call_operand.vmem [shape: bf16[5,64], index: 3, kind: input, shape index: {}]   ;;  %s645_s4 = inlined_call_operand.vmem [shape: f32[1,64], index: 4, kind: input, shape index: {}]   ;;  %s646_s5 = inlined_call_operand.hbm [shape: bf16[64,64], index: 5, kind: input, shape index: {}]   ;;  %s647_s6 = inlined_call_operand.vmem [shape: f32[1,64], index: 6, kind: input, shape index: {}]   ;;  %s648_s7 = inlined_call_operand.vmem [shape: bf16[2,64], index: 7, kind: input, shape index: {}]   ;;  %s649_s8 = inlined_call_operand.vmem [shape: f32[2,1], index: 8, kind: input, shape index: {}]   ;;  %s650_s9 = inlined_call_operand.hbm [shape: f32[2,8], index: 9, kind: output, shape index: {}]  }
   0x1   :  { %15 = vsyncpa [#allocation6], 0 }
   0x2   :  { %16 = vsyncpa [#allocation9], 0 }
   0x3   :  { %17 = vsyncpa [#allocation4], 0  ;;  %s543_s30 = smov [#allocation5]   ;;  %s544_s11 = smov [#allocation2]  }
   0x4   :  { %s34_s10 = sshll.u32 %s543_s30, 4  ;;  %s24_s12 = sshll.u32 %s544_s11, 4  ;;  %s35_s10 = int_to_ptr.vmem [resolvable:$true] %s34_s10  ;;  %s25_s12 = int_to_ptr.vmem [resolvable:$true] %s24_s12 }
   0x5   :  { %s443_s13 = scalar_lea.vmem %s35_s10, 128  ;;  %p448_p1 = scmp.lt.s32.totalorder %s35_s10, %s35_s10 }
   0x6   :  { %p444_p0 = scmp.ne.s32.totalorder %s35_s10, %s443_s13  ;;  %p449_p2 = scmp.lt.s32.totalorder %s443_s13, %s443_s13 }
   0x8   :  { %p450_p3 = por %p449_p2, %p448_p1 }
   0xa   :  { %p451_p4 = pnand %p450_p3, %p444_p0 }
   0xc   :  { %454 = shalt.err (!%p451_p4)
}
   0xd   :  { %37 = dma.hbm_to_vmem [thread:$0]  %s642_s1, 128, %s35_s10, [#allocation6]  }
   0xe   :  { %s463_s16 = scalar_lea.vmem %s25_s12, 128  ;;  %p468_p6 = scmp.lt.s32.totalorder %s25_s12, %s25_s12 }
   0xf   :  { %p464_p5 = scmp.ne.s32.totalorder %s25_s12, %s463_s16  ;;  %p469_p7 = scmp.lt.s32.totalorder %s463_s16, %s463_s16 }
  0x11   :  { %p470_p8 = por %p469_p7, %p468_p6 }
  0x13   :  { %p471_p9 = pnand %p470_p8, %p464_p5 }
  0x15   :  { %474 = shalt.err (!%p471_p9)
}
  0x16   :  { %27 = dma.hbm_to_vmem [thread:$0]  %s641_s0, 128, %s25_s12, [#allocation3]  }
  0x17   :  { %s545_s19 = smov [#allocation7]  }
  0x18   :  { %s43_s20 = sshll.u32 %s545_s19, 4  ;;  %s44_s20 = int_to_ptr.vmem [resolvable:$true] %s43_s20 }
  0x19   :  { %s483_s21 = scalar_lea.vmem %s44_s20, 128  ;;  %p488_p11 = scmp.lt.s32.totalorder %s44_s20, %s44_s20 }
  0x1a   :  { %p484_p10 = scmp.ne.s32.totalorder %s44_s20, %s483_s21  ;;  %p489_p12 = scmp.lt.s32.totalorder %s483_s21, %s483_s21 }
  0x1c   :  { %p490_p13 = por %p489_p12, %p488_p11 }
  0x1e   :  { %p491_p0 = pnand %p490_p13, %p484_p10 }
  0x20   :  { %494 = shalt.err (!%p491_p0)
}
  0x21   :  { %s546_s1 = smov 64   ;;  %s547_s22 = smov 4  }
  0x22   :  { %49 = dma.hbm_to_vmem [thread:$0]  %s643_s2, 128, %s44_s20, [#allocation6], %s546_s1, %s546_s1, %s547_s22  }
  0x23   :  { %s548_s25 = smov [#allocation8]  }
  0x24   :  { %s59_s26 = sshll.u32 %s548_s25, 4  ;;  %s60_s26 = int_to_ptr.vmem [resolvable:$true] %s59_s26 }
  0x25   :  { %s503_s0 = scalar_lea.vmem %s60_s26, 512  ;;  %p508_p2 = scmp.lt.s32.totalorder %s60_s26, %s60_s26 }
  0x26   :  { %p504_p1 = scmp.ne.s32.totalorder %s60_s26, %s503_s0  ;;  %p509_p3 = scmp.lt.s32.totalorder %s503_s0, %s503_s0 }
  0x28   :  { %p510_p4 = por %p509_p3, %p508_p2 }
  0x2a   :  { %p511_p5 = pnand %p510_p4, %p504_p1 }
  0x2c   :  { %514 = shalt.err (!%p511_p5)
}
  0x2d   :  { %65 = dma.hbm_to_vmem [thread:$0]  %s646_s5, 512, %s60_s26, [#allocation9], %s546_s1, %s546_s1, %s547_s22  }
  0x2e   :  { %535 = dma.done.wait [#allocation3], 128  }
  0x2f   :  { %536 = vsyncadd [#allocation3], 4294967168 }
  0x30   :  { %537 = dma.done.wait [#allocation6], 256  }
  0x31   :  { %538 = vsyncadd [#allocation6], 4294967040 }
  0x32   :  { %539 = dma.done.wait [#allocation9], 512  }
  0x33   :  { %540 = vsyncadd [#allocation9], 4294966784  ;;  %vm96_vm0 = vcmask 1041408   ;;  %v549_v0 = vmov 0.0   ;;  %vm152_vm1 = vcmask 1044480   ;;  %vm97_vm2 = vcmask 1042432  }
  0x34   :  { %388 = vmatprep.subr.bf16.mxu0 %v549_v0  ;;  %394 = vmatprep.subr.bf16.mxu1 %v549_v0  ;;  %v550_v1 = vmov 65535   ;;  %vm551_vm3 = vmmov 0   ;;  %vm153_vm4 = vcmask 1045504   ;;  %v91_v6 = vld [vmem:[%s644_s3] sm:$0x7]  ;;  %v87_v9 = vld [vmem:[#allocation5] sm:$0xff] }
  0x35   :  { %v98_v2 = vsel %vm96_vm0, 4294967295, %v550_v1  ;;  %390 = vmatprep.mubr.msk.bf16.mxu0 %vm551_vm3, %v549_v0  ;;  %396 = vmatprep.mubr.msk.bf16.mxu1 %vm551_vm3, %v549_v0  ;;  %v154_v3 = vsel %vm152_vm1, 4294967295, %v550_v1  ;;  %v430_v8 = vld [vmem:[#allocation7] sm:$0x3f]   ;;  %v85_v10 = vld [vmem:[#allocation2] sm:$0xff]  ;;  %v88_v11 = vpack.c.bf16 %v87_v9, %v87_v9  ;;  %vm92_vm5 = vcmask 39936  }
  0x36   :  { %v99_v4 = vsel %vm97_vm2, %v98_v2, 0  ;;  %v155_v5 = vsel %vm153_vm4, %v154_v3, 0  ;;  %v431_v12 = vld [vmem:[#allocation8 + $0x18] sm:$0xff]   ;;  %v86_v14 = vpack.c.bf16 %v85_v10, %v85_v10  ;;  %vm148_vm6 = vcmask 89088   ;;  %v432_v15 = vld [vmem:[#allocation8 + $0x10] sm:$0xff]   ;;  %v433_v16 = vld [vmem:[#allocation8 + $0x8] sm:$0xff]  }
  0x37   :  { %v101_v7 = vand.u32 %v99_v4, %v91_v6  ;;  %v157_v13 = vand.u32 %v430_v8, %v155_v5  ;;  %v434_v17 = vld [vmem:[#allocation8] sm:$0xff]   ;;  %v369_v21 = vld [vmem:[%s645_s4] ss:$0 sm:$0xff]  ;;  %vm248_vm7 = vcmask 523264   ;;  %v552_v32 = vmov 0  }
  0x38   :  { %v295_v31 = vld [vmem:[%s649_s8] sm:$0x3]  ;;  %429 = vset.pattern.permute.xlu0 %v552_v32  ;;  %s553_s8 = smov [#allocation10]   ;;  %vm347_vm8 = vcmask 58368  }
  0x39   :  { %389 = vmatpush3.bf16.msra.mxu0 %v101_v7  ;;  %395 = vmatpush3.bf16.msra.mxu1 %v157_v13  ;;  %v370_v33 = vld [vmem:[%s647_s6] ss:$0 sm:$0xff]  ;;  %s355_s14 = sshll.u32 %s553_s8, 4  ;;  %s356_s14 = int_to_ptr.vmem [resolvable:$true] %s355_s14 }
  0x3a   :  { %400 = vmatprep.subr.bf16.mxu0 %v549_v0  ;;  %412 = vmatprep.subr.bf16.mxu1 %v549_v0  ;;  %v293_v42 = vld [vmem:[%s648_s7] sm:$0x1]  ;;  %s515_s6 = scalar_lea.vmem %s356_s14, 32  ;;  %p520_p7 = scmp.lt.s32.totalorder %s356_s14, %s356_s14 }
  0x3b   :  { %298 = vperm.xlu0 %429, %v295_v31   ;;  %p516_p6 = scmp.ne.s32.totalorder %s356_s14, %s515_s6  ;;  %p521_p8 = scmp.lt.s32.totalorder %s515_s6, %s515_s6 }
  0x3c   :  { %391 = vmatmul.mubr.msk.bf16.vlgmr.msra.gmra.mxu0 %vm92_vm5, %v88_v11  ;;  %397 = vmatmul.mubr.msk.bf16.vlgmr.msra.gmra.mxu1 %vm148_vm6, %v86_v14 }
  0x3d   :  { %401 = vmatpush3.bf16.msra.mxu0 %v431_v12  ;;  %408 = vmatprep.mubr.msk.bf16.mxu0 %vm551_vm3, %v549_v0  ;;  %p522_p9 = por %p521_p8, %p520_p7 }
  0x3e   :  { %402 = vmatprep.subr.bf16.mxu0 %v549_v0  ;;  %414 = vmatprep.mubr.msk.bf16.mxu1 %vm551_vm3, %v549_v0 }
  0x3f   :  { %p523_p10 = pnand %p522_p9, %p516_p6 }
  0x41   :  { %403 = vmatpush3.bf16.msra.mxu0 %v432_v15 }
  0x42   :  { %404 = vmatprep.subr.bf16.mxu0 %v549_v0 }
  0x45   :  { %405 = vmatpush3.bf16.msra.mxu0 %v433_v16 }
  0x46   :  { %406 = vmatprep.subr.bf16.mxu0 %v549_v0 }
  0x49   :  { %407 = vmatpush3.bf16.msra.mxu0 %v434_v17 }
  0xb6   :  { %v299_v43 = vpop.permute.xlu0 %298 }
  0xfc   :  { %v137_v18 = vpop.f32.mrf.mxu0  ;;  %v193_v20 = vpop.f32.mrf.mxu1 }
  0xfd   :  { %v194_v22 = vadd.f32 %v193_v20, %v137_v18 }
  0xfe   :  { %v392_v19 = vpop.f32.mrf.mxu0  ;;  %v398_v24 = vpop.f32.mrf.mxu1 }
  0xff   :  { %v206_v25 = vadd.f32 %v369_v21, %v194_v22 }
 0x100   :  { %v140_v23 = vpop.f32.mrf.mxu0  ;;  %v196_v27 = vpop.f32.mrf.mxu1 }
 0x101   :  { %v207_v28 = vmax.f32 %v206_v25, 0.0 }
 0x102   :  { %v393_v26 = vpop.f32.mrf.mxu0  ;;  %v399_v29 = vpop.f32.mrf.mxu1 }
 0x103   :  { %v208_v30 = vpack.c.bf16 %v207_v28, %v207_v28 }
 0x105   :  { %409 = vmatmul.mubr.msk.bf16.vlgmr.msra.gmra.mxu0 %vm248_vm7, %v208_v30 }
 0x1c5   :  { %v286_v34 = vpop.f32.mrf.mxu0 }
 0x1c6   :  { %v287_v35 = vadd.f32 %v370_v33, %v286_v34 }
 0x1c7   :  { %v410_v36 = vpop.f32.mrf.mxu0 }
 0x1c8   :  { %v292_v37 = vmax.f32 %v287_v35, 0.0 }
 0x1c9   :  { %v289_v38 = vpop.f32.mrf.mxu0 }
 0x1ca   :  { %v294_v39 = vpack.c.bf16 %v292_v37, %v292_v37 }
 0x1cb   :  { %v411_v40 = vpop.f32.mrf.mxu0 }
 0x1cc   :  { %v305_v41 = vsel %vm248_vm7, %v294_v39, 0 }
 0x1cd   :  { %413 = vmatpush3.bf16.xpose.msra.mxu1 %v305_v41 }
 0x1d4   :  { %415 = vmatmul.mubr.msk.bf16.vlgmr.msra.gmra.mxu1 %vm248_vm7, %v293_v42 }
 0x294   :  { %v341_v44 = vpop.f32.mrf.mxu1 }
 0x295   :  { %v342_v45 = vadd.f32 %v341_v44, %v299_v43 }
 0x296   :  { %v416_v46 = vpop.f32.mrf.mxu1 }
 0x297   :  { %348 = vst.msk [vmem:[#allocation10] sm:$0x3] %vm347_vm8, %v342_v45 }
 0x298   :  { %v344_v47 = vpop.f32.mrf.mxu1 }
 0x299   :  { %526 = shalt.err (!%p523_p10)
}
 0x29a   :  { %358 = dma.vmem_to_hbm [thread:$0]  %s356_s14, 32, %s650_s9, [#allocation4]   ;;  %v417_v48 = vpop.f32.mrf.mxu1 }
 0x29b   :  { %541 = dma.done.wait [#allocation4], 32  }
 0x29c   :  { %542 = vsyncadd [#allocation4], 4294967264 }
 0x29d   :  { %362 = vsyncpa [#allocation3], 1 }
 0x29e   :  { %363 = vsyncpa [#allocation6], 1 }
 0x29f   :  { %364 = vsyncpa [#allocation9], 1 }
 0x2a0   :  { %365 = vsyncpa [#allocation4], 1 }

</bundles_post_ra>
